<compile_context>
chip_gen: v7x
topology: tpu7x:2x2x1
jax: 0.10.0
libtpu: 0.0.40
codegen_flags: <defaults>
</compile_context>

<pallas_src>
import jax
import jax.numpy as jnp
from jax.experimental import pallas as pl
from jax.experimental.pallas import tpu as pltpu

EPS = 1e-5
_MAX_L_TILE = 2048                     # lanes per tile
_MAX_NB = 16                           # batch elements fused per grid step (unroll bound)
_TARGET_STEP_BYTES = 4 * 1024 * 1024   # ~4 MiB of HBM traffic per grid step
_VMEM_STEP_BUDGET = 20 * 1024 * 1024   # per-step VMEM budget (io blocks x2 + temps)


def _pad8(n):
    return -(-n // 8) * 8


def _choose_l_tile(L):
    """Largest 128-multiple divisor of L (<= _MAX_L_TILE); else the full L."""
    if L % 128 == 0:
        t = min(_MAX_L_TILE, L)
        t -= t % 128
        while t >= 128:
            if L % t == 0:
                return t
            t -= 128
    # Small or ragged L: a single full-L tile (lane-masked past L % 128).
    # TODO(synk): add a masked tail tile for very large ragged L instead.
    return L


def _choose_nb(N, C, G, l_tile, num_lt):
    """Batch elements per grid step: fat enough to amortize the ~0.35us step
    overhead, within VMEM, a divisor of N, and keeping >=2 total grid steps."""
    cpad, opad = _pad8(C), _pad8(C + G)
    per_n_hbm = (C + (C + G)) * l_tile * 4
    per_n_vmem = (2 * cpad + 2 * opad + 3 * cpad) * l_tile * 4  # dbl-buffered io + temps
    nb = max(1, _TARGET_STEP_BYTES // max(per_n_hbm, 1))
    nb = min(nb, max(1, _VMEM_STEP_BUDGET // max(per_n_vmem, 1)), N, _MAX_NB)
    while N % nb:
        nb -= 1
    # keep at least 2 grid steps so both v7x TensorCores get work
    while nb > 1 and (N // nb) * num_lt < 2:
        nb -= 1
        while N % nb:
            nb -= 1
    return nb


def single_layer_kernel(x_ref, scale_ref, shift_ref, lh_ref, rh_ref, w_ref, out_ref):
    # x_ref:   (NB, C, Lt)          scale/shift: (C, 1)
    # lh_ref / rh_ref: (NB, C, 1)   halo columns for this L-tile (BN+ReLU'd)
    # w_ref:   (3, G, C)            taps for a[l-1], a[l], a[l+1]
    # out_ref: (NB, C+G, Lt)        rows [0,C) = x passthrough, [C,C+G) = conv
    NB, C, Lt = x_ref.shape

    scale = scale_ref[...]                  # (C, 1) f32
    shift = shift_ref[...]
    w0 = w_ref[0]                           # (G, C) f32  -> multiplies a[l-1]
    w1 = w_ref[1]                           #            -> multiplies a[l]
    w2 = w_ref[2]                           #            -> multiplies a[l+1]

    # single (1, Lt) lane index, reused for both tile-edge patches
    lane = jax.lax.broadcasted_iota(jnp.int32, (1, Lt), 1)
    first = lane == 0
    last = lane == Lt - 1

    for n in range(NB):                     # static unroll; leading-dim slices are free
        xn = x_ref[n]                       # (C, Lt)

        # fused channel concat: pass the input channels straight through
        out_ref[n, pl.ds(0, C), :] = xn.astype(out_ref.dtype)

        # folded BatchNorm (x*scale + shift) + ReLU
        a = jnp.maximum(xn.astype(jnp.float32) * scale + shift, 0.0)

        # k=3 neighbours via XLU lane rotation; edge lanes patched from halos
        a_m1 = jnp.where(first, lh_ref[n], pltpu.roll(a, 1, 1))        # a[l-1]
        a_p1 = jnp.where(last, rh_ref[n], pltpu.roll(a, Lt - 1, 1))    # a[l+1]

        # three small MXU dots accumulated in f32 (no sublane concat)
        conv = (jnp.dot(w1, a, preferred_element_type=jnp.float32)
                + jnp.dot(w0, a_m1, preferred_element_type=jnp.float32)
                + jnp.dot(w2, a_p1, preferred_element_type=jnp.float32))
        out_ref[n, pl.ds(C, conv.shape[0]), :] = conv.astype(out_ref.dtype)


def single_layer(x, gamma, beta, weight):
    """x: (N, C, L); gamma/beta: (C,); weight: (G, C, 3) as nn.Conv1d (bias=False).
    Returns (N, C+G, L) like the PyTorch module (training-mode BatchNorm)."""
    N, C, L = x.shape
    G = weight.shape[0]
    xf = x.astype(jnp.float32)

    # ---- one-pass BatchNorm batch statistics, folded to per-channel scale/shift ----
    cnt = N * L
    s1 = jnp.sum(xf, axis=(0, 2))
    s2 = jnp.sum(xf * xf, axis=(0, 2))
    mean = s1 / cnt
    var = jnp.maximum(s2 / cnt - mean * mean, 0.0)                 # biased variance
    scale = gamma.astype(jnp.float32) * jax.lax.rsqrt(var + EPS)   # (C,)
    shift = beta.astype(jnp.float32) - mean * scale                # (C,)
    scale2 = scale.reshape(C, 1)
    shift2 = shift.reshape(C, 1)

    # ---- conv taps stacked on a leading axis: (3, G, C) ----
    w3 = jnp.transpose(weight.astype(jnp.float32), (2, 0, 1))

    # ---- tiling ----
    L_TILE = _choose_l_tile(L)
    num_lt = L // L_TILE
    NB = _choose_nb(N, C, G, L_TILE, num_lt)
    num_nb = N // NB

    # ---- halo columns per (n, tile): BN+ReLU'd neighbours, zero at sequence ends ----
    starts = jnp.arange(num_lt) * L_TILE
    li = starts - 1
    ri = starts + L_TILE
    sc = scale[None, :, None]
    sh = shift[None, :, None]
    xl = jnp.take(xf, jnp.clip(li, 0, L - 1), axis=2)              # (N, C, T)
    xr = jnp.take(xf, jnp.clip(ri, 0, L - 1), axis=2)
    al = jnp.where(li[None, None, :] >= 0, jnp.maximum(xl * sc + sh, 0.0), 0.0)
    ar = jnp.where(ri[None, None, :] <= L - 1, jnp.maximum(xr * sc + sh, 0.0), 0.0)
    left_halo = jnp.transpose(al, (0, 2, 1))[..., None]            # (N, T, C, 1)
    right_halo = jnp.transpose(ar, (0, 2, 1))[..., None]           # (N, T, C, 1)

    out = pl.pallas_call(
        single_layer_kernel,
        out_shape=jax.ShapeDtypeStruct((N, C + G, L), x.dtype),
        grid=(num_nb, num_lt),
        in_specs=[
            pl.BlockSpec((NB, C, L_TILE), lambda n, t: (n, 0, t)),        # x tile
            pl.BlockSpec((C, 1), lambda n, t: (0, 0)),                    # scale (resident)
            pl.BlockSpec((C, 1), lambda n, t: (0, 0)),                    # shift (resident)
            pl.BlockSpec((NB, None, C, 1), lambda n, t: (n, t, 0, 0)),    # left halo
            pl.BlockSpec((NB, None, C, 1), lambda n, t: (n, t, 0, 0)),    # right halo
            pl.BlockSpec((3, G, C), lambda n, t: (0, 0, 0)),              # conv taps (resident)
        ],
        out_specs=pl.BlockSpec((NB, C + G, L_TILE), lambda n, t: (n, 0, t)),
        compiler_params=pltpu.CompilerParams(
            dimension_semantics=("parallel", "parallel"),
            vmem_limit_bytes=40 * 1024 * 1024,   # > tile needs, < v7x 64 MiB physical
        ),
        cost_estimate=pl.CostEstimate(
            flops=2 * N * L * 3 * C * G,
            transcendentals=0,
            bytes_accessed=4 * (N * C * L + N * (C + G) * L
                                + 3 * G * C + 2 * C + 2 * N * C * num_lt),
        ),
    )(x, scale2, shift2, left_halo, right_halo, w3)
    return out


if __name__ == "__main__":
    key = jax.random.PRNGKey(0)
    kx, kw = jax.random.split(key)

    # small shapes: nChannels=4, growthRate=8, batch=2, seq length=16
    N, C, L, G = 2, 4, 16, 8
    x = jax.random.normal(kx, (N, C, L), jnp.float32)

    # BatchNorm1d defaults; Conv1d kaiming-uniform-like init (bias=False in the module)
    gamma = jnp.ones((C,), jnp.float32)
    beta = jnp.zeros((C,), jnp.float32)
    bound = 1.0 / (C * 3) ** 0.5
    weight = jax.random.uniform(kw, (G, C, 3), jnp.float32, minval=-bound, maxval=bound)

    out = jax.block_until_ready(jax.jit(single_layer)(x, gamma, beta, weight))

    # plain-JAX reference (training-mode BatchNorm, biased variance)
    mean = jnp.mean(x, axis=(0, 2), keepdims=True)
    var = jnp.mean((x - mean) ** 2, axis=(0, 2), keepdims=True)
    a_ref = jnp.maximum(
        (x - mean) / jnp.sqrt(var + EPS) * gamma[None, :, None] + beta[None, :, None],
        0.0)
    conv_ref = jax.lax.conv_general_dilated(
        a_ref, weight, window_strides=(1,), padding=[(1, 1)],
        dimension_numbers=("NCH", "OIH", "NCH"))
    ref = jnp.concatenate([x, conv_ref], axis=1)

    assert out.shape == (N, C + G, L)
    assert jnp.allclose(out, ref, atol=1e-4, rtol=1e-4)
    print("KERNEL_OK")
</pallas_src>

<mosaic_0001>
module attributes {stable_mosaic.version = 11 : i64} {
  func.func @single_layer_kernel(%arg0: i32, %arg1: i32, %arg2: memref<1x4x16xf32, #tpu.memory_space<vmem>>, %arg3: memref<4x1xf32, #tpu.memory_space<vmem>>, %arg4: memref<4x1xf32, #tpu.memory_space<vmem>>, %arg5: memref<1x1x4x1xf32, #tpu.memory_space<vmem>>, %arg6: memref<1x1x4x1xf32, #tpu.memory_space<vmem>>, %arg7: memref<3x8x4xf32, #tpu.memory_space<vmem>>, %arg8: memref<1x12x16xf32, #tpu.memory_space<vmem>>) attributes {dimension_semantics = [#tpu.dimension_semantics<parallel>, #tpu.dimension_semantics<parallel>], iteration_bounds = array<i64: 2, 1>, scalar_prefetch = 0 : i64, scratch_operands = 0 : i64, tpu.core_type = #tpu.core_type<tc>, window_params = [{transform_indices = @transform_0, window_bounds = array<i64: 1, 4, 16>}, {pipeline_mode = #tpu.pipeline_mode<synchronous>, transform_indices = @transform_1, window_bounds = array<i64: 4, 1>}, {pipeline_mode = #tpu.pipeline_mode<synchronous>, transform_indices = @transform_2, window_bounds = array<i64: 4, 1>}, {transform_indices = @transform_3, window_bounds = array<i64: 1, 1, 4, 1>}, {transform_indices = @transform_4, window_bounds = array<i64: 1, 1, 4, 1>}, {pipeline_mode = #tpu.pipeline_mode<synchronous>, transform_indices = @transform_5, window_bounds = array<i64: 3, 8, 4>}, {transform_indices = @transform_6, window_bounds = array<i64: 1, 12, 16>}]} {
    %c0 = arith.constant 0 : index
    %c0_0 = arith.constant 0 : index
    %0 = vector.load %arg3[%c0, %c0_0] : memref<4x1xf32, #tpu.memory_space<vmem>>, vector<4x1xf32>
    %c0_1 = arith.constant 0 : index
    %c0_2 = arith.constant 0 : index
    %1 = vector.load %arg4[%c0_1, %c0_2] : memref<4x1xf32, #tpu.memory_space<vmem>>, vector<4x1xf32>
    %c0_3 = arith.constant 0 : index
    %c0_4 = arith.constant 0 : index
    %c0_5 = arith.constant 0 : index
    %2 = vector.load %arg7[%c0_3, %c0_4, %c0_5] : memref<3x8x4xf32, #tpu.memory_space<vmem>>, vector<1x8x4xf32>
    %3 = vector.shape_cast %2 : vector<1x8x4xf32> to vector<8x4xf32>
    %c1 = arith.constant 1 : index
    %c0_6 = arith.constant 0 : index
    %c0_7 = arith.constant 0 : index
    %4 = vector.load %arg7[%c1, %c0_6, %c0_7] : memref<3x8x4xf32, #tpu.memory_space<vmem>>, vector<1x8x4xf32>
    %5 = vector.shape_cast %4 : vector<1x8x4xf32> to vector<8x4xf32>
    %c2 = arith.constant 2 : index
    %c0_8 = arith.constant 0 : index
    %c0_9 = arith.constant 0 : index
    %6 = vector.load %arg7[%c2, %c0_8, %c0_9] : memref<3x8x4xf32, #tpu.memory_space<vmem>>, vector<1x8x4xf32>
    %7 = vector.shape_cast %6 : vector<1x8x4xf32> to vector<8x4xf32>
    %8 = tpu.iota {dimensions = array<i32: 1>} : vector<1x16xi32>
    %c0_i32 = arith.constant 0 : i32
    %9 = vector.broadcast %c0_i32 : i32 to vector<1x16xi32>
    %10 = arith.cmpi eq, %8, %9 : vector<1x16xi32>
    %c15_i32 = arith.constant 15 : i32
    %11 = vector.broadcast %c15_i32 : i32 to vector<1x16xi32>
    %12 = arith.cmpi eq, %8, %11 : vector<1x16xi32>
    %c0_10 = arith.constant 0 : index
    %c0_11 = arith.constant 0 : index
    %c0_12 = arith.constant 0 : index
    %13 = vector.load %arg2[%c0_10, %c0_11, %c0_12] : memref<1x4x16xf32, #tpu.memory_space<vmem>>, vector<1x4x16xf32>
    %14 = vector.shape_cast %13 : vector<1x4x16xf32> to vector<4x16xf32>
    %c0_13 = arith.constant 0 : index
    %c0_14 = arith.constant 0 : index
    %c0_15 = arith.constant 0 : index
    %15 = vector.load %arg8[%c0_13, %c0_14, %c0_15] : memref<1x12x16xf32, #tpu.memory_space<vmem>>, vector<1x4x16xf32>
    %16 = vector.shape_cast %15 : vector<1x4x16xf32> to vector<4x16xf32>
    %17 = vector.shape_cast %14 : vector<4x16xf32> to vector<1x4x16xf32>
    tpu.vector_store %arg8[%c0_13, %c0_14, %c0_15], %17 {strides = array<i32>} : memref<1x12x16xf32, #tpu.memory_space<vmem>>, vector<1x4x16xf32>,
    %18 = vector.broadcast %0 : vector<4x1xf32> to vector<4x16xf32>
    %19 = arith.mulf %14, %18 : vector<4x16xf32>
    %20 = vector.broadcast %1 : vector<4x1xf32> to vector<4x16xf32>
    %21 = arith.addf %19, %20 : vector<4x16xf32>
    %cst = arith.constant 0.000000e+00 : f32
    %22 = vector.broadcast %cst : f32 to vector<4x16xf32>
    %23 = arith.maximumf %21, %22 : vector<4x16xf32>
    %c0_16 = arith.constant 0 : index
    %c0_17 = arith.constant 0 : index
    %c0_18 = arith.constant 0 : index
    %c0_19 = arith.constant 0 : index
    %24 = vector.load %arg5[%c0_16, %c0_17, %c0_18, %c0_19] : memref<1x1x4x1xf32, #tpu.memory_space<vmem>>, vector<1x1x4x1xf32>
    %25 = vector.shape_cast %24 : vector<1x1x4x1xf32> to vector<4x1xf32>
    %c1_i32 = arith.constant 1 : i32
    %26 = tpu.dynamic_rotate %23 by %c1_i32 dim 1 : vector<4x16xf32>, i32 -> vector<4x16xf32>
    %27 = vector.shape_cast %10 : vector<1x16xi1> to vector<1x16xi1>
    %28 = vector.broadcast %27 : vector<1x16xi1> to vector<4x16xi1>
    %29 = vector.shape_cast %25 : vector<4x1xf32> to vector<4x1xf32>
    %30 = vector.broadcast %29 : vector<4x1xf32> to vector<4x16xf32>
    %31 = arith.select %28, %30, %26 : vector<4x16xi1>, vector<4x16xf32>
    %c0_20 = arith.constant 0 : index
    %c0_21 = arith.constant 0 : index
    %c0_22 = arith.constant 0 : index
    %c0_23 = arith.constant 0 : index
    %32 = vector.load %arg6[%c0_20, %c0_21, %c0_22, %c0_23] : memref<1x1x4x1xf32, #tpu.memory_space<vmem>>, vector<1x1x4x1xf32>
    %33 = vector.shape_cast %32 : vector<1x1x4x1xf32> to vector<4x1xf32>
    %c15_i32_24 = arith.constant 15 : i32
    %34 = tpu.dynamic_rotate %23 by %c15_i32_24 dim 1 : vector<4x16xf32>, i32 -> vector<4x16xf32>
    %35 = vector.shape_cast %12 : vector<1x16xi1> to vector<1x16xi1>
    %36 = vector.broadcast %35 : vector<1x16xi1> to vector<4x16xi1>
    %37 = vector.shape_cast %33 : vector<4x1xf32> to vector<4x1xf32>
    %38 = vector.broadcast %37 : vector<4x1xf32> to vector<4x16xf32>
    %39 = arith.select %36, %38, %34 : vector<4x16xi1>, vector<4x16xf32>
    %cst_25 = arith.constant dense<0.000000e+00> : vector<8x16xf32>
    %40 = tpu.matmul %5, %23, %cst_25 {dimension_numbers = #tpu.dot_dimension_numbers<[1], [0], [0], [1], [0, 0, 1, 1], [], []>} : vector<8x4xf32>, vector<4x16xf32>, vector<8x16xf32> -> vector<8x16xf32>
    %cst_26 = arith.constant dense<0.000000e+00> : vector<8x16xf32>
    %41 = tpu.matmul %3, %31, %cst_26 {dimension_numbers = #tpu.dot_dimension_numbers<[1], [0], [0], [1], [0, 0, 1, 1], [], []>} : vector<8x4xf32>, vector<4x16xf32>, vector<8x16xf32> -> vector<8x16xf32>
    %42 = arith.addf %40, %41 : vector<8x16xf32>
    %cst_27 = arith.constant dense<0.000000e+00> : vector<8x16xf32>
    %43 = tpu.matmul %7, %39, %cst_27 {dimension_numbers = #tpu.dot_dimension_numbers<[1], [0], [0], [1], [0, 0, 1, 1], [], []>} : vector<8x4xf32>, vector<4x16xf32>, vector<8x16xf32> -> vector<8x16xf32>
    %44 = arith.addf %42, %43 : vector<8x16xf32>
    %c0_28 = arith.constant 0 : index
    %c4 = arith.constant 4 : index
    %c0_29 = arith.constant 0 : index
    %45 = vector.load %arg8[%c0_28, %c4, %c0_29] : memref<1x12x16xf32, #tpu.memory_space<vmem>>, vector<1x8x16xf32>
    %46 = vector.shape_cast %45 : vector<1x8x16xf32> to vector<8x16xf32>
    %47 = vector.shape_cast %44 : vector<8x16xf32> to vector<1x8x16xf32>
    tpu.vector_store %arg8[%c0_28, %c4, %c0_29], %47 {strides = array<i32>} : memref<1x12x16xf32, #tpu.memory_space<vmem>>, vector<1x8x16xf32>,
    return
  }
  func.func @transform_0(%arg0: i32, %arg1: i32) -> (i32, i32, i32) {
    %c0_i32 = arith.constant 0 : i32
    %c0_i32_0 = arith.constant 0 : i32
    return %arg0, %c0_i32, %arg1 : i32, i32, i32
  }
  func.func @transform_1(%arg0: i32, %arg1: i32) -> (i32, i32) {
    %c0_i32 = arith.constant 0 : i32
    %c0_i32_0 = arith.constant 0 : i32
    %c0_i32_1 = arith.constant 0 : i32
    return %c0_i32, %c0_i32_0 : i32, i32
  }
  func.func @transform_2(%arg0: i32, %arg1: i32) -> (i32, i32) {
    %c0_i32 = arith.constant 0 : i32
    %c0_i32_0 = arith.constant 0 : i32
    %c0_i32_1 = arith.constant 0 : i32
    return %c0_i32, %c0_i32_0 : i32, i32
  }
  func.func @transform_3(%arg0: i32, %arg1: i32) -> (i32, i32, i32, i32) {
    %c0_i32 = arith.constant 0 : i32
    %c0_i32_0 = arith.constant 0 : i32
    %c0_i32_1 = arith.constant 0 : i32
    return %arg0, %arg1, %c0_i32, %c0_i32_0 : i32, i32, i32, i32
  }
  func.func @transform_4(%arg0: i32, %arg1: i32) -> (i32, i32, i32, i32) {
    %c0_i32 = arith.constant 0 : i32
    %c0_i32_0 = arith.constant 0 : i32
    %c0_i32_1 = arith.constant 0 : i32
    return %arg0, %arg1, %c0_i32, %c0_i32_0 : i32, i32, i32, i32
  }
  func.func @transform_5(%arg0: i32, %arg1: i32) -> (i32, i32, i32) {
    %c0_i32 = arith.constant 0 : i32
    %c0_i32_0 = arith.constant 0 : i32
    %c0_i32_1 = arith.constant 0 : i32
    %c0_i32_2 = arith.constant 0 : i32
    return %c0_i32, %c0_i32_0, %c0_i32_1 : i32, i32, i32
  }
  func.func @transform_6(%arg0: i32, %arg1: i32) -> (i32, i32, i32) {
    %c0_i32 = arith.constant 0 : i32
    %c0_i32_0 = arith.constant 0 : i32
    return %arg0, %c0_i32, %arg1 : i32, i32, i32
  }
}

</mosaic_0001>

<bundles_post_ra>
// kernel: single_layer.1
= control target key start
LH: loop header
LB: loop body
LE: loop exit
PB: predicated region body
PF: predicated region fallthrough
CT: control target
= control target key end

     0   :  { %s880_s21 = smov 0   ;;  %s882_s22 = smov 0   ;;  %s949_s0 = inlined_call_operand.vmem [shape: f32[2,4,16], index: 0, kind: input, shape index: {}]   ;;  %s950_s1 = inlined_call_operand.vmem [shape: f32[4,1], index: 1, kind: input, shape index: {}]   ;;  %s951_s2 = inlined_call_operand.vmem [shape: f32[4,1], index: 2, kind: input, shape index: {}]   ;;  %s952_s3 = inlined_call_operand.vmem [shape: f32[2,1,4,1], index: 3, kind: input, shape index: {}, may-alias: {3,4}]   ;;  %s953_s4 = inlined_call_operand.vmem [shape: f32[2,1,4,1], index: 4, kind: input, shape index: {}, may-alias: {3,4}]   ;;  %s954_s5 = inlined_call_operand.vmem [shape: f32[3,8,4], index: 5, kind: input, shape index: {}]   ;;  %s955_s6 = inlined_call_operand.vmem [shape: f32[2,12,16], index: 6, kind: output, shape index: {}]  }
   0x1   :  { %s884_s23 = smov 0  }
   0x2 LB: > { %s28_s24 = sadd.s32 1, %s833_s22  ;;  %p742_p0 = scmp.ge.s32.totalorder %s837_s23, 1  ;;  %s837_s23 = sphi %s884_s23, %s16_s23   ;;  %s833_s22 = sphi %s882_s22, %s957_s22   ;;  %s829_s21 = sphi %s880_s21, %s956_s21  }
   0x3   : > { %p30_p1 = scmp.ge.s32.totalorder %s28_s24, 2  ;;  %p258_p2 = scmp.lt.s32.totalorder %s837_s23, 3 }
   0x5   : > { %s959_s24 = smov (%p30_p1, %s28_s24), 0  ;;  %p259_p3 = pnand %p742_p0, %p258_p2 }
   0x6   : > { %v336_v0 = vld [vmem:[%s950_s1] sm:$0xf] (!%p259_p3)  ;;  %p307_p4 = scmp.lt.s32.totalorder (!%p259_p3), %s829_s21, 1  ;;  %v839_v1 = vmov (!%p259_p3), 0   ;;  %vm348_vm0 = vcmask (!%p259_p3), 125952   ;;  %v840_v5 = vmov (!%p259_p3), 0.0   ;;  %v343_v17 = vlaneseq (!%p259_p3) }
   0x7   : > { %262 = sbr.rel (%p259_p3) target bundleno = 708 (0x2c4), region = 44  ;;  %813 = vset.pattern.permute.xlu0 (!%p259_p3), %v839_v1  ;;  %814 = vset.pattern.permute.xlu1 (!%p259_p3), %v839_v1  ;;  %v337_v2 = vld [vmem:[%s951_s2] sm:$0xf] (!%p259_p3)  ;;  %vm399_vm1 = vcmask (!%p259_p3), 1043456   ;;  %s841_s16 = smov (!%p259_p3), 16   ;;  %v748_v11 = vld [vmem:[%s954_s5 + $0x8] sm:$0xff] (!%p259_p3) }
   0x8   : > { %352 = vperm.xlu0 (!%p259_p3), %813, %v336_v0   ;;  %770 = vmatprep.subr.mxu0 (!%p259_p3), %v840_v5  ;;  %vm395_vm2 = vcmask (!%p259_p3), 31744   ;;  %vm842_vm3 = vmmov (!%p259_p3), 0   ;;  %vm364_vm4 = vcmask (!%p259_p3), 1047680   ;;  %s843_s25 = smov (!%p259_p3), 127   ;;  %s844_s26 = smov (!%p259_p3), 113   ;;  %v344_v19 = vand.u32 (!%p259_p3), 127, %v343_v17 }
   0x9   : > { %765 = vmatprep.subr.mxu1 (!%p259_p3), %v840_v5  ;;  %772 = vmatprep.mubr.msk.f32.mxu0 (!%p259_p3), %vm842_vm3, %v840_v5  ;;  %v338_v23 = vld [vmem:[%s954_s5] sm:$0xff] (!%p259_p3)  ;;  %v749_v24 = vld [vmem:[%s954_s5 + $0x10] sm:$0xff] (!%p259_p3)  ;;  %vm626_vm7 = vcmask (!%p259_p3), 130048  }
   0xa   : > { %767 = vmatprep.mubr.msk.f32.mxu1 (!%p259_p3), %vm842_vm3, %v840_v5  ;;  %vm346_vm5 = vcmp.eq.s32.totalorder (!%p259_p3), %v344_v19, 15  ;;  %vm345_vm6 = vcmp.eq.s32.totalorder (!%p259_p3), %v344_v19, 0 }
   0xc   : > { %358 = vperm.xlu0 (!%p259_p3), %813, %v337_v2  }
   0xe   : > { %s961_s21 = smov (!%p307_p4, %s829_s21), 1 }
   0xf   : > { %s904_s29 = sshll.u32 %s961_s21, 2  ;;  %s758_s30 = sshll.u32 %s961_s21, 4 }
  0x10   : > { %s320_s9 = scalar_lea.vmem %s952_s3, %s904_s29  ;;  %s313_s12 = scalar_lea.vmem %s949_s0, %s904_s29 }
  0x11   : > { %s917_s15 = scalar_lea.vmem %s955_s6, %s758_s30  ;;  %v347_v3 = vld [vmem:[%s313_s12] sm:$0xf]  ;;  %s327_s21 = scalar_lea.vmem %s953_s4, %s904_s29 }
  0x12   : > { %v363_v4 = vld [vmem:[%s320_s9] sm:$0xf]  ;;  %349 = vst.msk [vmem:[%s917_s15] sm:$0xf] %vm348_vm0, %v347_v3 }
  0x13   : > { %375 = vperm.xlu0 %813, %v363_v4   ;;  %v383_v14 = vld [vmem:[%s327_s21] sm:$0xf] }
  0x87   : > { %v353_v6 = vpop.permute.xlu0 %352 }
  0x88   : > { %v355_v7 = vmul.f32 %v353_v6, %v347_v3 }
  0x8b   : > { %v359_v8 = vpop.permute.xlu0 %358 }
  0x8c   : > { %v361_v9 = vadd.f32 %v359_v8, %v355_v7 }
  0x8e   : > { %v362_v10 = vmax.f32 %v361_v9, 0.0 }
  0x90   : > { %365 = vrot.lane.b32.xlu1 %v362_v10, %s841_s16  ;;  %771 = vmatpush3.msk.msra.mxu0 %vm399_vm1, %v362_v10 }
  0x91   : > { %775 = vmatprep.subr.mxu0 %v840_v5  ;;  %773 = vmatmul.mubr.msk.f32.vlgmr.msra.gmra.mrb[0].mxu0 %vm395_vm2, %v748_v11 }
  0x92   : > { %777 = vmatprep.mubr.msk.f32.mxu0 %vm842_vm3, %v840_v5  ;;  %v376_v20 = vpop.permute.xlu0 %375 }
 0x102   : > { %v366_v12 = vpop.permute.xlu1 %365 }
 0x103   : > { %v367_v13 = vsel %vm364_vm4, %v366_v12, %v362_v10 }
 0x104   : > { %368 = vrot.lane.b32.xlu1 %v367_v13, %s841_s16 }
 0x108   : > { %388 = vperm.xlu1 %814, %v383_v14  }
 0x176   : > { %v369_v15 = vpop.permute.xlu1 %368 }
 0x177   : > { %v370_v16 = vsel %vm364_vm4, %v369_v15, %v362_v10 }
 0x178   : > { %391 = vrot.lane.b32.xlu1 %v370_v16, %s843_s25  ;;  %379 = vrot.lane.b32.xlu0 %v370_v16, %s844_s26 }
 0x187   : > { %v389_v18 = vpop.permute.xlu1 %388 }
 0x1ea   : > { %v380_v21 = vpop.permute.xlu0 %379  ;;  %v392_v22 = vpop.permute.xlu1 %391 }
 0x1eb   : > { %v394_v25 = vsel %vm346_vm5, %v389_v18, %v392_v22  ;;  %v382_v26 = vsel %vm345_vm6, %v376_v20, %v380_v21 }
 0x1ec   : > { %766 = vmatpush3.msk.msra.mxu1 %vm399_vm1, %v382_v26  ;;  %776 = vmatpush3.msk.msra.mxu0 %vm399_vm1, %v394_v25 }
 0x1ed   : > { %768 = vmatmul.mubr.msk.f32.vlgmr.msra.gmra.mrb[0].mxu1 %vm395_vm2, %v338_v23  ;;  %778 = vmatmul.mubr.msk.f32.vlgmr.msra.gmra.mrb[0].mxu0 %vm395_vm2, %v749_v24 }
 0x2c0   : > { %v469_v27 = vpop.f32.mrb[0].mxu1  ;;  %v621_v28 = vpop.f32.mrb[0].mxu0 }
 0x2c1   : > { %v780_v29 = vadd.f32 %v621_v28, %v469_v27  ;;  %v779_v30 = vpop.f32.mrb[1].mxu0  ;;  %v769_v31 = vpop.f32.mrb[1].mxu1 }
 0x2c3   : > { %627 = vst.msk [vmem:[%s917_s15 + $0x4] sm:$0xff] %vm626_vm7, %v780_v29 }
 0x2c4 PF: > { %s16_s23 = sadd.s32 1, %s837_s23   ;;  %s956_s21 = smov %s833_s22 }
 0x2c5   : > { %p13_p5 = scmp.ge.s32.totalorder %s16_s23, 4   ;;  %s957_s22 = smov %s959_s24 }
 0x2c7   :  { %15 = sbr.rel (!%p13_p5) target bundleno = 2 (0x2), region = 82 }

</bundles_post_ra>
